<compile_context>
chip_gen: v7x
topology: tpu7x:2x2x1
jax: 0.10.0
libtpu: 0.0.40
codegen_flags: <defaults>
</compile_context>

<pallas_src>
import math

import jax
import jax.numpy as jnp
from jax.experimental import pallas as pl
from jax.experimental.pallas import tpu as pltpu

NUM_CLASSES = 5  # len(label_map)

# log-sum-exp of the constant logits [1, 0, 0, 0, 0].
_CONST_LSE = math.log(math.e + (NUM_CLASSES - 1))

_LANES = 128
_SUBLANES = 8
_MAX_BLOCK_ROWS = 1024  # 1024 * 128 * 4 B = 512 KiB labels block per grid step


def _count_class0_kernel(labels_ref, partial_ref):
    # labels_ref:  (block_rows, 128) int32  -- lane/sublane dense labels tile
    # partial_ref: (8, 128) float32         -- this block's class-0 count,
    #                                          replicated so the store is a full
    #                                          unmasked (8,128) vreg tile.
    eq = (labels_ref[...] == 0).astype(jnp.float32)          # (block_rows, 128)
    count = jnp.sum(eq, axis=-1, keepdims=True)              # (block_rows, 1) lane reduce
    count = jnp.sum(count, axis=0, keepdims=True)            # (1, 1)
    partial_ref[...] = jnp.broadcast_to(count, partial_ref.shape)


def most_frequent_baseline(input_ids: jax.Array, labels: jax.Array):
    """Returns (loss: f32 scalar, logits: f32[B, NUM_CLASSES])."""
    # input_ids only contributes its static batch dimension; no HBM->VMEM DMA.
    B = input_ids.shape[0]

    # Constant logits: built in plain XLA (constant-folded/fused), not in-kernel.
    logits = jnp.broadcast_to(
        jnp.array([1.0] + [0.0] * (NUM_CLASSES - 1), jnp.float32),
        (B, NUM_CLASSES),
    )

    # Lane/sublane-dense labels: pad to (num_blocks * block_rows, 128) with a
    # non-zero fill value so padded entries never count as class 0.
    rows = max(pl.cdiv(B, _LANES), 1)
    rows = ((rows + _SUBLANES - 1) // _SUBLANES) * _SUBLANES
    block_rows = min(_MAX_BLOCK_ROWS, rows)
    num_blocks = pl.cdiv(rows, block_rows)
    rows = num_blocks * block_rows
    padded_b = rows * _LANES

    labels_i32 = labels.astype(jnp.int32)
    labels_padded = jnp.full((padded_b,), 1, jnp.int32).at[:B].set(labels_i32)
    labels_2d = labels_padded.reshape(rows, _LANES)

    partials = pl.pallas_call(
        _count_class0_kernel,
        out_shape=jax.ShapeDtypeStruct((num_blocks * _SUBLANES, _LANES), jnp.float32),
        grid=(num_blocks,),
        in_specs=[pl.BlockSpec((block_rows, _LANES), lambda i: (i, 0))],
        out_specs=pl.BlockSpec((_SUBLANES, _LANES), lambda i: (i, 0)),
        compiler_params=pltpu.CompilerParams(
            dimension_semantics=("parallel",),  # shardable across v7x's 2 TCs
        ),
    )(labels_2d)

    # Tiny final reduce + scalar finalize in the wrapper (exact: integer counts).
    counts = partials.reshape(num_blocks, _SUBLANES, _LANES)[:, 0, 0]
    total_class0 = jnp.sum(counts)
    loss = jnp.float32(_CONST_LSE) - total_class0 * jnp.float32(1.0 / B)
    return loss, logits


def _reference(input_ids, labels):
    B = input_ids.shape[0]
    logits = jnp.zeros((B, NUM_CLASSES), jnp.float32).at[:, 0].set(1.0)
    logp = jax.nn.log_softmax(logits, axis=-1)
    loss = -jnp.mean(
        jnp.take_along_axis(logp, labels[:, None].astype(jnp.int32), axis=-1)
    )
    return loss, logits


if __name__ == "__main__":
    key = jax.random.PRNGKey(0)
    k_ids, k_lab = jax.random.split(key)

    batch, seq = 2, 8
    input_ids = jax.random.randint(k_ids, (batch, seq), 0, 1000, dtype=jnp.int32)
    labels = jax.random.randint(k_lab, (batch,), 0, NUM_CLASSES, dtype=jnp.int32)

    loss, logits = most_frequent_baseline(input_ids, labels)
    jax.block_until_ready((loss, logits))

    ref_loss, ref_logits = _reference(input_ids, labels)
    assert jnp.allclose(logits, ref_logits), "logits mismatch"
    assert jnp.allclose(loss, ref_loss, atol=1e-5), "loss mismatch"

    print("KERNEL_OK")
</pallas_src>

<mosaic_0001>
module attributes {stable_mosaic.version = 11 : i64} {
  func.func @_count_class0_kernel(%arg0: i32, %arg1: memref<8x128xi32, #tpu.memory_space<vmem>>, %arg2: memref<8x128xf32, #tpu.memory_space<vmem>>) attributes {dimension_semantics = [#tpu.dimension_semantics<parallel>], iteration_bounds = array<i64: 1>, scalar_prefetch = 0 : i64, scratch_operands = 0 : i64, tpu.core_type = #tpu.core_type<tc>, window_params = [{transform_indices = @transform_0, window_bounds = array<i64: 8, 128>}, {transform_indices = @transform_1, window_bounds = array<i64: 8, 128>}]} {
    %c0 = arith.constant 0 : index
    %c0_0 = arith.constant 0 : index
    %0 = vector.load %arg1[%c0, %c0_0] : memref<8x128xi32, #tpu.memory_space<vmem>>, vector<8x128xi32>
    %c0_i32 = arith.constant 0 : i32
    %1 = vector.broadcast %c0_i32 : i32 to vector<8x128xi32>
    %2 = arith.cmpi eq, %0, %1 : vector<8x128xi32>
    %3 = arith.extui %2 : vector<8x128xi1> to vector<8x128xi32>
    %4 = arith.sitofp %3 : vector<8x128xi32> to vector<8x128xf32>
    %cst = arith.constant dense<0.000000e+00> : vector<8xf32>
    %5 = vector.multi_reduction <add>, %4, %cst [1] : vector<8x128xf32> to vector<8xf32>
    %6 = vector.shape_cast %5 : vector<8xf32> to vector<8x1xf32>
    %cst_1 = arith.constant dense<0.000000e+00> : vector<1xf32>
    %7 = vector.multi_reduction <add>, %6, %cst_1 [0] : vector<8x1xf32> to vector<1xf32>
    %8 = vector.shape_cast %7 : vector<1xf32> to vector<1x1xf32>
    %9 = vector.shape_cast %8 : vector<1x1xf32> to vector<1x1xf32>
    %10 = vector.broadcast %9 : vector<1x1xf32> to vector<8x128xf32>
    %c0_2 = arith.constant 0 : index
    %c0_3 = arith.constant 0 : index
    %11 = vector.load %arg2[%c0_2, %c0_3] : memref<8x128xf32, #tpu.memory_space<vmem>>, vector<8x128xf32>
    tpu.vector_store %arg2[%c0_2, %c0_3], %10 {strides = array<i32>} : memref<8x128xf32, #tpu.memory_space<vmem>>, vector<8x128xf32>,
    return
  }
  func.func @transform_0(%arg0: i32) -> (i32, i32) {
    %c0_i32 = arith.constant 0 : i32
    %c0_i32_0 = arith.constant 0 : i32
    return %arg0, %c0_i32 : i32, i32
  }
  func.func @transform_1(%arg0: i32) -> (i32, i32) {
    %c0_i32 = arith.constant 0 : i32
    %c0_i32_0 = arith.constant 0 : i32
    return %arg0, %c0_i32 : i32, i32
  }
}

</mosaic_0001>

<bundles_post_ra>
// kernel: tpu_custom_call.1
= control target key start
LH: loop header
LB: loop body
LE: loop exit
PB: predicated region body
PF: predicated region fallthrough
CT: control target
= control target key end

     0   :  { %6 = vsyncpa [#allocation3], 0  ;;  %s138_s0 = inlined_call_operand.hbm [shape: s32[8,128], index: 0, kind: input, shape index: {}]   ;;  %s139_s1 = inlined_call_operand.hbm [shape: f32[8,128], index: 1, kind: output, shape index: {}]  }
   0x1   :  { %7 = vsyncpa [#allocation4], 0  ;;  %s101_s6 = smov [#allocation2]   ;;  %s53_s10 = scalar_lea.hbm %s138_s0, 128 }
   0x2   :  { %s14_s7 = sshll.u32 %s101_s6, 4  ;;  %p54_p0 = scmp.ne.s32.totalorder %s138_s0, %s53_s10  ;;  %s15_s7 = int_to_ptr.vmem [resolvable:$true] %s14_s7 }
   0x3   :  { %p57_p1 = scmp.lt.u32.totalorder %s53_s10, %s138_s0 }
   0x5   :  { %p59_p2 = pnand %p57_p1, %p54_p0 }
   0x7   :  { %62 = shalt.err (!%p59_p2)
}
   0x8   :  { %s63_s15 = scalar_lea.vmem %s15_s7, 128  ;;  %p68_p4 = scmp.lt.s32.totalorder %s15_s7, %s15_s7 }
   0x9   :  { %p64_p3 = scmp.ne.s32.totalorder %s15_s7, %s63_s15  ;;  %p69_p5 = scmp.lt.s32.totalorder %s63_s15, %s63_s15 }
   0xb   :  { %p70_p6 = por %p69_p5, %p68_p4 }
   0xd   :  { %p71_p7 = pnand %p70_p6, %p64_p3 }
   0xf   :  { %74 = shalt.err (!%p71_p7)
}
  0x10   :  { %17 = dma.hbm_to_vmem [thread:$0]  %s138_s0, 128, %s15_s7, [#allocation3]  }
  0x11   :  { %97 = dma.done.wait [#allocation3], 128  }
  0x12   :  { %98 = vsyncadd [#allocation3], 4294967168  ;;  %v21_v0 = vld [vmem:[#allocation2] sm:$0xff]  ;;  %v102_v1 = vmov 0.0   ;;  %s103_s18 = smov [#allocation5]  }
  0x13   :  { %vm22_vm0 = vcmp.eq.s32.totalorder %v21_v0, 0  ;;  %s40_s19 = sshll.u32 %s103_s18, 4  ;;  %s41_s19 = int_to_ptr.vmem [resolvable:$true] %s40_s19 }
  0x14   :  { %v49_v2 = vsel %vm22_vm0, 1.0, %v102_v1  ;;  %s75_s20 = scalar_lea.vmem %s41_s19, 128  ;;  %p80_p9 = scmp.lt.s32.totalorder %s41_s19, %s41_s19 }
  0x15   :  { %25 = vadd.xlane.f32.xlu0 %v49_v2  ;;  %p76_p8 = scmp.ne.s32.totalorder %s41_s19, %s75_s20  ;;  %p81_p10 = scmp.lt.s32.totalorder %s75_s20, %s75_s20 }
  0x17   :  { %p82_p11 = por %p81_p10, %p80_p9 }
  0x19   :  { %p83_p12 = pnand %p82_p11, %p76_p8 }
  0xa2   :  { %v26_v3 = vpop.xlane.xlu0 %25 }
  0xa3   :  { %v27_v4 = vrot.slane %v26_v3, 4 }
  0xa5   :  { %v28_v5 = vadd.f32 %v27_v4, %v26_v3 }
  0xa7   :  { %v29_v6 = vrot.slane %v28_v5, 2 }
  0xa9   :  { %v30_v7 = vadd.f32 %v29_v6, %v28_v5 }
  0xab   :  { %v31_v8 = vrot.slane %v30_v7, 1 }
  0xad   :  { %v32_v9 = vadd.f32 %v31_v8, %v30_v7 }
  0xaf   :  { %33 = vst [vmem:[#allocation5] sm:$0xff] %v32_v9 }
  0xb0   :  { %86 = shalt.err (!%p83_p12)
}
  0xb1   :  { %s87_s22 = scalar_lea.hbm %s139_s1, 128 }
  0xb2   :  { %p88_p13 = scmp.ne.s32.totalorder %s139_s1, %s87_s22  ;;  %p91_p0 = scmp.lt.u32.totalorder %s87_s22, %s139_s1 }
  0xb4   :  { %p93_p1 = pnand %p91_p0, %p88_p13 }
  0xb6   :  { %96 = shalt.err (!%p93_p1)
}
  0xb7   :  { %43 = dma.vmem_to_hbm [thread:$0]  %s41_s19, 128, %s139_s1, [#allocation4]  }
  0xb8   :  { %99 = dma.done.wait [#allocation4], 128  }
  0xb9   :  { %100 = vsyncadd [#allocation4], 4294967168 }
  0xba   :  { %47 = vsyncpa [#allocation3], 1 }
  0xbb   :  { %48 = vsyncpa [#allocation4], 1 }

</bundles_post_ra>
